<compile_context>
chip_gen: v5e
topology: v5e:2x2
jax: 0.10.0
libtpu: 0.0.40
codegen_flags: <defaults>
</compile_context>

<pallas_src>
import jax
import jax.numpy as jnp
from jax import lax
from jax.experimental import pallas as pl
from jax.experimental.pallas import tpu as pltpu
import numpy as np


def maws_kernel(x0_ref, c_ref, idx_ref):
    # x0_ref: (1, L, S) f32  -- x[:, :, 0, :] block for one batch element
    # c_ref : (1, L, S) f32  -- contributions block for one batch element
    # idx_ref: (1, 1, S) i32 -- descending-argsort indices for this batch elem
    S = x0_ref.shape[2]

    # Mean over the layer/head axis (axis=1).
    weights = jnp.mean(x0_ref[...], axis=1)            # (1, S)
    contrib = jnp.mean(c_ref[...], axis=1)             # (1, S)
    scores = contrib * weights                         # (1, S)

    # Descending argsort via O(S^2) pairwise comparisons (stable tie-break
    # by original index, matching a stable descending sort).
    s_i = scores[:, :, None]                           # (1, S, 1)
    s_j = scores[:, None, :]                           # (1, 1, S)
    i_idx = lax.broadcasted_iota(jnp.int32, (1, S, S), 1)   # row index i
    j_idx = lax.broadcasted_iota(jnp.int32, (1, S, S), 2)   # col index j

    # element j is ranked before element i if it is strictly larger, or equal
    # with a smaller original index.
    before = (s_j > s_i) | ((s_j == s_i) & (j_idx < i_idx))     # (1, S, S)
    rank = jnp.sum(before.astype(jnp.int32), axis=2)            # (1, S)

    # Invert the permutation: idx[r] = i such that rank[i] == r.
    # Reuse i_idx as the output slot r and j_idx as the candidate index i.
    match = rank[:, None, :] == i_idx                           # (1, S, S)
    idx = jnp.sum(jnp.where(match, j_idx, 0), axis=2)           # (1, S)

    idx_ref[...] = idx[:, None, :].astype(jnp.int32)            # (1, 1, S)


def maws_forward(x, contributions):
    """Returns (None, max_inx) like the PyTorch MAWS module."""
    B, L, S, S2 = x.shape
    assert S == S2 and contributions.shape == (B, L, S)

    # Only query row 0 of x is ever used; slice before the pallas_call so the
    # kernel never touches the other S-1 query rows.
    x0 = x[:, :, 0, :]                                          # (B, L, S)

    out = pl.pallas_call(
        maws_kernel,
        out_shape=jax.ShapeDtypeStruct((B, 1, S), jnp.int32),
        grid=(B,),
        in_specs=[
            pl.BlockSpec((1, L, S), lambda b: (b, 0, 0)),
            pl.BlockSpec((1, L, S), lambda b: (b, 0, 0)),
        ],
        out_specs=pl.BlockSpec((1, 1, S), lambda b: (b, 0, 0)),
        compiler_params=pltpu.CompilerParams(
            dimension_semantics=("parallel",)),
    )(x0, contributions)
    return None, out.reshape(B, S)


if __name__ == "__main__":
    # Small shapes consistent with the forward: x (B, L, S, S), contributions (B, L, S)
    B, L, S = 2, 4, 16
    key = jax.random.PRNGKey(0)
    kx, kc = jax.random.split(key)
    x = jax.random.uniform(kx, (B, L, S, S), dtype=jnp.float32)
    contributions = jax.random.uniform(kc, (B, L, S), dtype=jnp.float32)

    none_out, max_inx = maws_forward(x, contributions)
    max_inx = jax.block_until_ready(max_inx)

    # Pure-JAX reference check (ties are measure-zero for random floats).
    weights_ref = jnp.mean(x[:, :, 0, :], axis=1)
    contrib_ref = jnp.mean(contributions, axis=1)
    scores_ref = contrib_ref * weights_ref
    idx_ref = jnp.argsort(-scores_ref, axis=1)
    np.testing.assert_array_equal(np.asarray(max_inx), np.asarray(idx_ref))

    print("KERNEL_OK")
</pallas_src>

<mosaic_0001>
module attributes {stable_mosaic.version = 11 : i64} {
  func.func @maws_kernel(%arg0: i32, %arg1: memref<1x4x16xf32, #tpu.memory_space<vmem>>, %arg2: memref<1x4x16xf32, #tpu.memory_space<vmem>>, %arg3: memref<1x1x16xi32, #tpu.memory_space<vmem>>) attributes {dimension_semantics = [#tpu.dimension_semantics<parallel>], iteration_bounds = array<i64: 2>, scalar_prefetch = 0 : i64, scratch_operands = 0 : i64, tpu.core_type = #tpu.core_type<tc>, window_params = [{transform_indices = @transform_0, window_bounds = array<i64: 1, 4, 16>}, {transform_indices = @transform_1, window_bounds = array<i64: 1, 4, 16>}, {transform_indices = @transform_2, window_bounds = array<i64: 1, 1, 16>}]} {
    %c0 = arith.constant 0 : index
    %c0_0 = arith.constant 0 : index
    %c0_1 = arith.constant 0 : index
    %0 = vector.load %arg1[%c0, %c0_0, %c0_1] : memref<1x4x16xf32, #tpu.memory_space<vmem>>, vector<1x4x16xf32>
    %cst = arith.constant dense<0.000000e+00> : vector<1x16xf32>
    %1 = vector.multi_reduction <add>, %0, %cst [1] : vector<1x4x16xf32> to vector<1x16xf32>
    %cst_2 = arith.constant 4.000000e+00 : f32
    %2 = vector.broadcast %cst_2 : f32 to vector<1x16xf32>
    %3 = arith.divf %1, %2 : vector<1x16xf32>
    %c0_3 = arith.constant 0 : index
    %c0_4 = arith.constant 0 : index
    %c0_5 = arith.constant 0 : index
    %4 = vector.load %arg2[%c0_3, %c0_4, %c0_5] : memref<1x4x16xf32, #tpu.memory_space<vmem>>, vector<1x4x16xf32>
    %cst_6 = arith.constant dense<0.000000e+00> : vector<1x16xf32>
    %5 = vector.multi_reduction <add>, %4, %cst_6 [1] : vector<1x4x16xf32> to vector<1x16xf32>
    %cst_7 = arith.constant 4.000000e+00 : f32
    %6 = vector.broadcast %cst_7 : f32 to vector<1x16xf32>
    %7 = arith.divf %5, %6 : vector<1x16xf32>
    %8 = arith.mulf %7, %3 : vector<1x16xf32>
    %9 = vector.shape_cast %8 : vector<1x16xf32> to vector<1x16x1xf32>
    %10 = vector.shape_cast %8 : vector<1x16xf32> to vector<1x1x16xf32>
    %11 = tpu.iota {dimensions = array<i32: 1>} : vector<1x16x16xi32>
    %12 = tpu.iota {dimensions = array<i32: 2>} : vector<1x16x16xi32>
    %13 = vector.broadcast %10 : vector<1x1x16xf32> to vector<1x16x16xf32>
    %14 = vector.broadcast %9 : vector<1x16x1xf32> to vector<1x16x16xf32>
    %15 = arith.cmpf ogt, %13, %14 : vector<1x16x16xf32>
    %16 = vector.broadcast %10 : vector<1x1x16xf32> to vector<1x16x16xf32>
    %17 = vector.broadcast %9 : vector<1x16x1xf32> to vector<1x16x16xf32>
    %18 = arith.cmpf oeq, %16, %17 : vector<1x16x16xf32>
    %19 = arith.cmpi slt, %12, %11 : vector<1x16x16xi32>
    %20 = arith.andi %18, %19 : vector<1x16x16xi1>
    %21 = arith.ori %15, %20 : vector<1x16x16xi1>
    %22 = arith.extui %21 : vector<1x16x16xi1> to vector<1x16x16xi32>
    %cst_8 = arith.constant dense<0> : vector<1x16xi32>
    %23 = vector.multi_reduction <add>, %22, %cst_8 [2] : vector<1x16x16xi32> to vector<1x16xi32>
    %24 = vector.shape_cast %23 : vector<1x16xi32> to vector<1x1x16xi32>
    %25 = vector.broadcast %24 : vector<1x1x16xi32> to vector<1x16x16xi32>
    %26 = arith.cmpi eq, %25, %11 : vector<1x16x16xi32>
    %c0_i32 = arith.constant 0 : i32
    %27 = vector.broadcast %c0_i32 : i32 to vector<1x16x16xi32>
    %28 = arith.select %26, %12, %27 : vector<1x16x16xi1>, vector<1x16x16xi32>
    %cst_9 = arith.constant dense<0> : vector<1x16xi32>
    %29 = vector.multi_reduction <add>, %28, %cst_9 [2] : vector<1x16x16xi32> to vector<1x16xi32>
    %30 = vector.shape_cast %29 : vector<1x16xi32> to vector<1x1x16xi32>
    %c0_10 = arith.constant 0 : index
    %c0_11 = arith.constant 0 : index
    %c0_12 = arith.constant 0 : index
    %31 = vector.load %arg3[%c0_10, %c0_11, %c0_12] : memref<1x1x16xi32, #tpu.memory_space<vmem>>, vector<1x1x16xi32>
    tpu.vector_store %arg3[%c0_10, %c0_11, %c0_12], %30 {strides = array<i32>} : memref<1x1x16xi32, #tpu.memory_space<vmem>>, vector<1x1x16xi32>,
    return
  }
  func.func @transform_0(%arg0: i32) -> (i32, i32, i32) {
    %c0_i32 = arith.constant 0 : i32
    %c0_i32_0 = arith.constant 0 : i32
    %c0_i32_1 = arith.constant 0 : i32
    return %arg0, %c0_i32, %c0_i32_0 : i32, i32, i32
  }
  func.func @transform_1(%arg0: i32) -> (i32, i32, i32) {
    %c0_i32 = arith.constant 0 : i32
    %c0_i32_0 = arith.constant 0 : i32
    %c0_i32_1 = arith.constant 0 : i32
    return %arg0, %c0_i32, %c0_i32_0 : i32, i32, i32
  }
  func.func @transform_2(%arg0: i32) -> (i32, i32, i32) {
    %c0_i32 = arith.constant 0 : i32
    %c0_i32_0 = arith.constant 0 : i32
    %c0_i32_1 = arith.constant 0 : i32
    return %arg0, %c0_i32, %c0_i32_0 : i32, i32, i32
  }
}

</mosaic_0001>

<bundles_post_ra>
// kernel: tpu_custom_call.1
= control target key start
LH: loop header
LB: loop body
LE: loop exit
PB: predicated region body
PF: predicated region fallthrough
CT: control target
= control target key end

     0   :  { %7 = vsyncpa [#allocation3], 0  ;;  %s1329_s0 = inlined_call_operand.hbm [shape: f32[2,4,16], index: 0, kind: input, shape index: {}]   ;;  %s1330_s1 = inlined_call_operand.hbm [shape: f32[2,4,16], index: 1, kind: input, shape index: {}]   ;;  %s1331_s2 = inlined_call_operand.hbm [shape: s32[2,1,16], index: 2, kind: output, shape index: {}]  }
   0x1   :  { %9 = vsyncpa [#allocation3 + $0x1], 0 }
   0x2   :  { %10 = vsyncpa [#allocation6], 0 }
   0x3   :  { %12 = vsyncpa [#allocation6 + $0x1], 0 }
   0x4   :  { %13 = vsyncpa [#allocation4], 0 }
   0x5   :  { %15 = vsyncpa [#allocation4 + $0x1], 0  ;;  %s897_s9 = smov 0   ;;  %s899_s10 = smov 0  }
   0x6   :  { %s901_s11 = smov 0   ;;  %s903_s12 = smov 0  }
   0x7 LB: > { %s918_s13 = sadd.s32 4294967295, %s878_s12   ;;  %s674_s14 = sadd.s32 4294967294, %s878_s12   ;;  %s878_s12 = sphi %s903_s12, %s1360_s12   ;;  %s874_s11 = sphi %s901_s11, %s1359_s11   ;;  %s870_s10 = sphi %s899_s10, %s1358_s10   ;;  %s866_s9 = sphi %s897_s9, %s1357_s9  }
   0x8   : > { %s922_s15 = sadd.s32 1, %s878_s12   ;;  %s28_s16 = sadd.s32 1, %s874_s11 }
   0x9   : > { %s25_s17 = ssub.s32 %s878_s12, %s922_s15  ;;  %p35_p0 = scmp.ne.s32.totalorder %s874_s11, %s870_s10 }
   0xa   : > { %p26_p1 = scmp.eq.s32.totalorder %s25_s17, 0  ;;  %p36_p2 = scmp.eq.s32.totalorder %s878_s12, 0 }
   0xb   : > { %p41_p3 = scmp.ne.s32.totalorder %s870_s10, %s866_s9  ;;  %p42_p4 = scmp.eq.s32.totalorder %s918_s13, 0 }
   0xc   : > { %s934_s18 = scalar_select %p26_p1, %s874_s11, %s28_s16  }
   0xd   : > { %p936_p5 = por %p36_p2, %p35_p0  ;;  %p940_p6 = por %p42_p4, %p41_p3 }
   0xe   : > { %p91_p7 = scmp.eq.s32.totalorder %s918_s13, 1  ;;  %p97_p8 = scmp.eq.s32.totalorder %s674_s14, 1 }
   0xf   : > { %p703_p10 = scmp.lt.s32.totalorder %s878_s12, 2  ;;  %s956_s23 = sand.u32 1, %s874_s11  }
  0x10   : > { %p947_p11 = por %p91_p7, %p35_p0  ;;  %p951_p12 = por %p97_p8, %p41_p3 }
  0x11   : > { %s678_s24 = sshll.u32 %s878_s12, 2  ;;  %s677_s25 = sshll.u32 %s956_s23, 2 }
  0x12   : > { %s125_s28 = scalar_lea.hbm %s1329_s0, %s678_s24  ;;  %s121_s30 = scalar_lea.vmem [#allocation2], %s677_s25 }
  0x13   : > { %s127_s29 = sshll.u32 %s125_s28, 4  ;;  %s129_s3 = sshll.u32 %s121_s30, 4  ;;  %s128_s29 = int_to_ptr.hbm [resolvable:$true] %s127_s29  ;;  %s130_s3 = int_to_ptr.vmem [resolvable:$true] %s129_s3 }
  0x14   : > { %p965_p13 = pnand %p703_p10, %p936_p5  ;;  %p681_p0 = scmp.ge.s32.totalorder %s878_s12, 1 }
  0x15   : > { %p153_p1 = scmp.lt.s32.totalorder %s878_s12, 3  ;;  %s118_s5 = scalar_lea.sflag [#allocation3], %s956_s23 }
  0x16   : > { %s748_s6 = sshra.s32 %s128_s29, 4  ;;  %p752_p3 = pneg %p965_p13  ;;  %s749_s6 = int_to_ptr.hbm [resolvable:$true] %s748_s6 }
  0x17   : > { %s750_s7 = scalar_lea.hbm %s749_s6, 4  ;;  %s755_s16 = scalar_lea.hbm %s1329_s0, 8 }
  0x18   : > { %p751_p2 = scmp.ne.s32.totalorder %s749_s6, %s750_s7  ;;  %p756_p5 = scmp.lt.s32.totalorder %s749_s6, %s1329_s0 }
  0x19   : > { %p757_p8 = scmp.lt.s32.totalorder %s755_s16, %s750_s7 }
  0x1a   : > { %p753_p4 = pnand %p752_p3, %p751_p2 }
  0x1b   : > { %p758_p10 = por %p757_p8, %p756_p5 }
  0x1c   : > { %p754_p7 = pneg %p753_p4 }
  0x1e   : > { %p759_p9 = pnand %p758_p10, %p754_p7 }
  0x20   : > { %762 = shalt.err (!%p759_p9)
}
  0x21   : > { %695 = dma.hbm_to_vmem [thread:$0]  (!%p965_p13), %s128_s29, 64, %s130_s3, %s118_s5  }
  0x22   : > { %p989_p2 = pnand %p681_p0, %p153_p1  ;;  %s144_s30 = scalar_lea.hbm %s1330_s1, %s678_s24 }
  0x23   : > { %s146_s6 = sshll.u32 %s144_s30, 4  ;;  %s140_s7 = scalar_lea.vmem [#allocation5], %s677_s25  ;;  %s147_s6 = int_to_ptr.hbm [resolvable:$true] %s146_s6 }
  0x24   : > { %s148_s8 = sshll.u32 %s140_s7, 4  ;;  %s137_s14 = scalar_lea.sflag [#allocation6], %s956_s23  ;;  %s149_s8 = int_to_ptr.vmem [resolvable:$true] %s148_s8 }
  0x25   : > { %s778_s16 = sshra.s32 %s147_s6, 4  ;;  %s785_s5 = scalar_lea.hbm %s1330_s1, 8  ;;  %s779_s16 = int_to_ptr.hbm [resolvable:$true] %s778_s16 }
  0x26   : > { %s780_s17 = scalar_lea.hbm %s779_s16, 4  ;;  %p786_p4 = scmp.lt.s32.totalorder %s779_s16, %s1330_s1 }
  0x27   : > { %p781_p9 = scmp.ne.s32.totalorder %s779_s16, %s780_s17  ;;  %p787_p7 = scmp.lt.s32.totalorder %s785_s5, %s780_s17 }
  0x29   : > { %p783_p0 = pnand %p781_p9, %p752_p3  ;;  %p788_p5 = por %p787_p7, %p786_p4 }
  0x2b   : > { %p784_p1 = pneg %p783_p0 }
  0x2d   : > { %p789_p8 = pnand %p788_p5, %p784_p1 }
  0x2f   : > { %792 = shalt.err (!%p789_p8)
}
  0x30   : > { %698 = dma.hbm_to_vmem [thread:$0]  (!%p965_p13), %s147_s6, 64, %s149_s8, %s137_s14  }
  0x31   : > { %157 = sbr.rel (%p989_p2) target bundleno = 683 (0x2ab), region = 28  ;;  %s1011_s23 = sand.u32 (!%p989_p2), 1, %s870_s10  }
  0x32   : > { %s682_s25 = sshll.u32 (!%p989_p2), %s1011_s23, 2  ;;  %s160_s27 = scalar_lea.sflag (!%p989_p2), [#allocation3], %s1011_s23 }
  0x33   : > { %s163_s28 = scalar_lea.vmem (!%p989_p2), [#allocation2], %s682_s25 }
  0x36   : > { %853 = dma.done.wait (%p940_p6), %s160_s27, 64  }
  0x37   : > { %855 = vsyncadd (%p940_p6), %s160_s27, 4294967232  ;;  %s170_s4 = scalar_lea.sflag [#allocation6], %s1011_s23  ;;  %s173_s30 = scalar_lea.vmem [#allocation5], %s682_s25 }
  0x38   : > { %857 = dma.done.wait (%p940_p6), %s170_s4, 64  }
  0x39   : > { %859 = vsyncadd (%p940_p6), %s170_s4, 4294967232  ;;  %v226_v0 = vlaneseq  ;;  %v880_v1 = vmov 4.0   ;;  %vm200_vm0 = vcmask 125952   ;;  %v199_v5 = vld [vmem:[%s163_s28] sm:$0xf]  ;;  %v881_v27 = vmov 0   ;;  %s581_s6 = scalar_lea.hbm %s1331_s2, %s918_s13 }
  0x3a   : > { %746 = vrcp.f32 %v880_v1  ;;  %v216_v6 = vld [vmem:[%s173_s30] sm:$0xf]  ;;  %v201_v8 = vsel %vm200_vm0, %v199_v5, 0.0  ;;  %vm255_vm6 = vcmask 130048   ;;  %s198_s7 = scalar_lea.vmem [#allocation7], %s1011_s23  ;;  %s585_s14 = sshll.u32 %s581_s6, 4  ;;  %s586_s14 = int_to_ptr.hbm [resolvable:$true] %s585_s14 }
  0x3b   : > { %v1024_v2 = vshrl.u32 %v226_v0, 7  ;;  %v1032_v7 = vand.u32 127, %v226_v0  ;;  %v217_v10 = vsel %vm200_vm0, %v216_v6, 0.0  ;;  %v202_v11 = vrot.slane %v201_v8, 4  ;;  %s583_s8 = sshll.u32 %s198_s7, 4  ;;  %s573_s16 = scalar_lea.sflag [#allocation4], %s1011_s23  ;;  %s584_s8 = int_to_ptr.vmem [resolvable:$true] %s583_s8 }
  0x3c   : > { %v218_v12 = vrot.slane %v217_v10, 4  ;;  %s822_s13 = sshra.s32 %s586_s14, 4  ;;  %s828_s5 = scalar_lea.hbm %s1331_s2, 2  ;;  %s823_s13 = int_to_ptr.hbm [resolvable:$true] %s822_s13 }
  0x3d   : > { %741 = vset.pattern.permute.xlu0 %v1024_v2  ;;  %v1028_v3 = vadd.s32 8, %v1024_v2  ;;  %739 = vset.pattern.permute.xlu1 %v1024_v2  ;;  %v203_v14 = vadd.f32 %v202_v11, %v201_v8  ;;  %vm247_vm2 = vcmp.lt.s32.totalorder %v1032_v7, %v1024_v2  ;;  %v282_v52 = vperm.slane %v1024_v2, 0  ;;  %s824_s17 = scalar_lea.hbm %s823_s13, 1  ;;  %p829_p10 = scmp.lt.s32.totalorder %s823_s13, %s1331_s2 }
  0x3e   : > { %v219_v15 = vadd.f32 %v218_v12, %v217_v10  ;;  %v283_v53 = vperm.slane %v1024_v2, 1  ;;  %p825_p6 = scmp.ne.s32.totalorder %s823_s13, %s824_s17  ;;  %p830_p2 = scmp.lt.s32.totalorder %s828_s5, %s824_s17 }
  0x3f   : > { %740 = vset.pattern.permute.xlu2 %v1028_v3  ;;  %v204_v17 = vrot.slane %v203_v14, 2  ;;  %vm248_vm8 = vcmp.lt.s32.totalorder %v1032_v7, %v1028_v3  ;;  %v295_v58 = vperm.slane %v1028_v3, 5  ;;  %v293_v59 = vperm.slane %v1028_v3, 3 }
  0x40   : > { %v747_v4 = vpop.eup %746  ;;  %v220_v18 = vrot.slane %v219_v15, 2  ;;  %v294_v60 = vperm.slane %v1028_v3, 4  ;;  %v297_v61 = vperm.slane %v1028_v3, 7  ;;  %v296_v62 = vperm.slane %v1028_v3, 6  ;;  %p826_p13 = pnand %p825_p6, %p947_p11  ;;  %p831_p9 = por %p830_p2, %p829_p10 }
  0x41   : > { %v209_v9 = vmul.f32 4.0, %v747_v4  ;;  %v205_v20 = vadd.f32 %v204_v17, %v203_v14  ;;  %vm213_vm1 = vweird.f32 %v747_v4  ;;  %v284_v17 = vperm.slane %v1024_v2, 2 }
  0x42   : > { %v221_v21 = vadd.f32 %v220_v18, %v219_v15  ;;  %v286_v18 = vperm.slane %v1024_v2, 4  ;;  %p827_p3 = pneg %p826_p13 }
  0x43   : > { %v210_v13 = vsub.f32 1.0, %v209_v9  ;;  %v206_v22 = vrot.slane %v205_v20, 1 }
  0x44   : > { %v222_v23 = vrot.slane %v221_v21, 1  ;;  %p832_p0 = pnand %p831_p9, %p827_p3 }
  0x45   : > { %v211_v16 = vmul.f32 %v747_v4, %v210_v13  ;;  %334 = vperm.xlu1 %739, %v1032_v7   ;;  %v207_v25 = vadd.f32 %v206_v22, %v205_v20  ;;  %v285_v22 = vperm.slane %v1024_v2, 3 }
  0x46   : > { %v223_v26 = vadd.f32 %v222_v23, %v221_v21 }
  0x47   : > { %v212_v19 = vadd.f32 %v747_v4, %v211_v16  ;;  %340 = vperm.xlu2 %740, %v1032_v7  }
  0x49   : > { %v214_v24 = vsel %vm213_vm1, %v747_v4, %v212_v19  ;;  %v1226_v4 = vadd.s32 4294967288, %v1032_v7 }
  0x4a   : > { %v215_v28 = vmul.f32 %v214_v24, %v207_v25  ;;  %v224_v29 = vmul.f32 %v223_v26, %v214_v24 }
  0x4c   : > { %v225_v30 = vmul.f32 %v224_v29, %v215_v28 }
  0x4d   : > { %745 = vset.pattern.permute.xlu1 %v881_v27 }
  0x4e   : > { %230 = vperm.xlu0 %741, %v225_v30  }
  0x4f   : > { %744 = vset.pattern.permute.xlu2 %v881_v27 }
  0x56   : > { %742 = vset.pattern.permute.xlu0 %v1028_v3 }
  0x5e   : > { %236 = vperm.xlu0 %742, %v225_v30  }
  0x66   : > { %743 = vset.pattern.permute.xlu0 %v881_v27 }
  0xa1   : > { %v1045_v47 = vpop.permute.xlu2 %340 }
  0xb7   : > { %v1043_v45 = vpop.permute.xlu1 %334 }
  0xc0   : > { %v231_v31 = vpop.permute.xlu0 %230 }
  0xc1   : > { %vm243_vm3 = vcmp.gt.f32.partialorder %v225_v30, %v231_v31  ;;  %vm245_vm4 = vcmp.eq.f32.partialorder %v225_v30, %v231_v31 }
  0xc2   : > { %vm249_vm5 = vmand %vm245_vm4, %vm247_vm2 }
  0xc3   : > { %vm251_vm7 = vmor %vm243_vm3, %vm249_vm5 }
  0xc4   : > { %v253_v32 = vsel %vm251_vm7, 1, %v881_v27 }
  0xc5   : > { %v256_v33 = vsel %vm255_vm6, %v253_v32, 0 }
  0xc6   : > { %v257_v34 = vand.u32 65535, %v256_v33  ;;  %v258_v36 = vshrl.u32 %v256_v33, 16 }
  0xc8   : > { %v259_v35 = vcvt.s32.f32 %v257_v34  ;;  %v260_v38 = vcvt.s32.f32 %v258_v36  ;;  %v287_v34 = vperm.slane %v1024_v2, 5 }
  0xca   : > { %261 = vadd.xlane.f32.xlu1 %v259_v35 }
  0xd0   : > { %v237_v37 = vpop.permute.xlu0 %236 }
  0xd1   : > { %vm244_vm9 = vcmp.gt.f32.partialorder %v225_v30, %v237_v37  ;;  %vm246_vm10 = vcmp.eq.f32.partialorder %v225_v30, %v237_v37 }
  0xd2   : > { %vm250_vm11 = vmand %vm246_vm10, %vm248_vm8  ;;  %263 = vadd.xlane.f32.xlu1 %v260_v38  ;;  %v289_v38 = vperm.slane %v1024_v2, 7 }
  0xd3   : > { %vm252_vm12 = vmor %vm244_vm9, %vm250_vm11 }
  0xd4   : > { %v254_v39 = vsel %vm252_vm12, 1, %v881_v27 }
  0xd5   : > { %v269_v40 = vsel %vm255_vm6, %v254_v39, 0  ;;  %v288_v39 = vperm.slane %v1024_v2, 6 }
  0xd6   : > { %v270_v41 = vand.u32 65535, %v269_v40  ;;  %v271_v43 = vshrl.u32 %v269_v40, 16 }
  0xd8   : > { %v272_v42 = vcvt.s32.f32 %v270_v41  ;;  %v273_v44 = vcvt.s32.f32 %v271_v43  ;;  %v290_v43 = vperm.slane %v1028_v3, 0 }
  0xda   : > { %274 = vadd.xlane.f32.xlu2 %v272_v42 }
  0xe2   : > { %276 = vadd.xlane.f32.xlu2 %v273_v44 }
 0x13d   : > { %v262_v46 = vpop.xlane.xlu1 %261 }
 0x13e   : > { %v265_v50 = vcvt.f32.s32 %v262_v46 }
 0x145   : > { %v264_v48 = vpop.xlane.xlu1 %263 }
 0x146   : > { %v266_v49 = vcvt.f32.s32 %v264_v48  ;;  %v292_v48 = vperm.slane %v1028_v3, 2 }
 0x148   : > { %v267_v51 = vshll.u32 %v266_v49, 16  ;;  %v291_v49 = vperm.slane %v1028_v3, 1 }
 0x14a   : > { %v1049_v54 = vadd.s32 %v267_v51, %v265_v50 }
 0x14c   : > { %vm298_vm13 = vcmp.eq.s32.totalorder %v1049_v54, %v282_v52  ;;  %vm300_vm14 = vcmp.eq.s32.totalorder %v1049_v54, %v283_v53  ;;  %vm1061_vm15 = vcmp.eq.s32.totalorder %v1049_v54, %v295_v58  ;;  %vm1069_vm0 = vcmp.eq.s32.totalorder %v1049_v54, %v294_v60 }
 0x14d   : > { %v275_v55 = vpop.xlane.xlu2 %274  ;;  %v342_v56 = vsel %vm298_vm13, %v1043_v45, 0  ;;  %v344_v57 = vsel %vm300_vm14, %v1043_v45, 0  ;;  %v368_v0 = vsel %vm1061_vm15, %v1043_v45, 0  ;;  %vm1076_vm1 = vcmp.eq.s32.totalorder %v1049_v54, %v293_v59 }
 0x14e   : > { %375 = vperm.xlu0 %743, %v342_v56   ;;  %381 = vperm.xlu2 %744, %v344_v57   ;;  %vm1081_vm2 = vcmp.eq.s32.totalorder %v1049_v54, %v297_v61  ;;  %v366_v6 = vsel %vm1069_vm0, %v1043_v45, 0  ;;  %v364_v8 = vsel %vm1076_vm1, %v1043_v45, 0  ;;  %vm1095_vm3 = vcmp.eq.s32.totalorder %v1049_v54, %v296_v62 }
 0x14f   : > { %v372_v9 = vsel %vm1081_vm2, %v1043_v45, 0  ;;  %v370_v11 = vsel %vm1095_vm3, %v1043_v45, 0  ;;  %v278_v14 = vcvt.f32.s32 %v275_v55  ;;  %vm306_vm8 = vcmp.eq.s32.totalorder %v1049_v54, %v286_v18 }
 0x150   : > { %vm304_vm9 = vcmp.eq.s32.totalorder %v1049_v54, %v285_v22  ;;  %vm302_vm10 = vcmp.eq.s32.totalorder %v1049_v54, %v284_v17  ;;  %v350_v31 = vsel %vm306_vm8, %v1043_v45, 0  ;;  %vm312_vm8 = vcmp.eq.s32.totalorder %v1049_v54, %v289_v38 }
 0x151   : > { %v348_v32 = vsel %vm304_vm9, %v1043_v45, 0  ;;  %v346_v33 = vsel %vm302_vm10, %v1043_v45, 0  ;;  %vm310_vm9 = vcmp.eq.s32.totalorder %v1049_v54, %v288_v39  ;;  %vm308_vm10 = vcmp.eq.s32.totalorder %v1049_v54, %v287_v34 }
 0x152   : > { %v356_v40 = vsel %vm312_vm8, %v1043_v45, 0  ;;  %v354_v41 = vsel %vm310_vm9, %v1043_v45, 0  ;;  %v352_v42 = vsel %vm308_vm10, %v1043_v45, 0  ;;  %vm318_vm8 = vcmp.eq.s32.totalorder %v1049_v54, %v292_v48 }
 0x153   : > { %vm316_vm9 = vcmp.eq.s32.totalorder %v1049_v54, %v291_v49  ;;  %vm314_vm10 = vcmp.eq.s32.totalorder %v1049_v54, %v290_v43  ;;  %v362_v50 = vsel %vm318_vm8, %v1043_v45, 0  ;;  %vm473_vm15 = vcmask 130112  }
 0x154   : > { %v360_v51 = vsel %vm316_vm9, %v1043_v45, 0  ;;  %vm520_vm0 = vcmask 1041409   ;;  %vm522_vm1 = vcmask 1042434   ;;  %vm524_vm2 = vcmask 1043459  }
 0x155   : > { %v277_v12 = vpop.xlane.xlu2 %276  ;;  %vm526_vm3 = vcmask 1044484  }
 0x156   : > { %v279_v13 = vcvt.f32.s32 %v277_v12 }
 0x158   : > { %v280_v15 = vshll.u32 %v279_v13, 16 }
 0x15a   : > { %v1102_v16 = vadd.s32 %v280_v15, %v278_v14 }
 0x15c   : > { %vm303_vm4 = vcmp.eq.s32.totalorder %v1102_v16, %v284_v17  ;;  %vm301_vm5 = vcmp.eq.s32.totalorder %v1102_v16, %v283_v53  ;;  %vm299_vm7 = vcmp.eq.s32.totalorder %v1102_v16, %v282_v52  ;;  %vm1117_vm11 = vcmp.eq.s32.totalorder %v1102_v16, %v296_v62 }
 0x15d   : > { %v347_v19 = vsel %vm303_vm4, %v1045_v47, 0  ;;  %v345_v20 = vsel %vm301_vm5, %v1045_v47, 0  ;;  %v343_v21 = vsel %vm299_vm7, %v1045_v47, 0  ;;  %vm1122_vm12 = vcmp.eq.s32.totalorder %v1102_v16, %v295_v58 }
 0x15e   : > { %390 = vperm.xlu2 %744, %v347_v19   ;;  %384 = vperm.xlu1 %745, %v345_v20   ;;  %vm1127_vm13 = vcmp.eq.s32.totalorder %v1102_v16, %v294_v60  ;;  %v371_v26 = vsel %vm1117_vm11, %v1045_v47, 0  ;;  %v369_v27 = vsel %vm1122_vm12, %v1045_v47, 0  ;;  %vm1141_vm14 = vcmp.eq.s32.totalorder %v1102_v16, %v297_v61 }
 0x15f   : > { %378 = vperm.xlu0 %743, %v343_v21   ;;  %v367_v28 = vsel %vm1127_vm13, %v1045_v47, 0  ;;  %v373_v30 = vsel %vm1141_vm14, %v1045_v47, 0  ;;  %vm309_vm4 = vcmp.eq.s32.totalorder %v1102_v16, %v287_v34  ;;  %vm307_vm5 = vcmp.eq.s32.totalorder %v1102_v16, %v286_v18 }
 0x160   : > { %vm305_vm7 = vcmp.eq.s32.totalorder %v1102_v16, %v285_v22  ;;  %v353_v35 = vsel %vm309_vm4, %v1045_v47, 0  ;;  %v351_v36 = vsel %vm307_vm5, %v1045_v47, 0  ;;  %vm315_vm4 = vcmp.eq.s32.totalorder %v1102_v16, %v290_v43 }
 0x161   : > { %v349_v37 = vsel %vm305_vm7, %v1045_v47, 0  ;;  %vm313_vm5 = vcmp.eq.s32.totalorder %v1102_v16, %v289_v38  ;;  %vm311_vm7 = vcmp.eq.s32.totalorder %v1102_v16, %v288_v39  ;;  %v359_v2 = vsel %vm315_vm4, %v1045_v47, 0 }
 0x162   : > { %v357_v44 = vsel %vm313_vm5, %v1045_v47, 0  ;;  %v355_v46 = vsel %vm311_vm7, %v1045_v47, 0  ;;  %v358_v52 = vsel %vm314_vm10, %v1043_v45, 0  ;;  %vm321_vm4 = vcmp.eq.s32.totalorder %v1102_v16, %v293_v59 }
 0x163   : > { %vm319_vm5 = vcmp.eq.s32.totalorder %v1102_v16, %v292_v48  ;;  %vm317_vm7 = vcmp.eq.s32.totalorder %v1102_v16, %v291_v49  ;;  %v365_v53 = vsel %vm321_vm4, %v1045_v47, 0  ;;  %vm528_vm11 = vcmask 1045509  }
 0x164   : > { %v363_v54 = vsel %vm319_vm5, %v1045_v47, 0  ;;  %v361_v55 = vsel %vm317_vm7, %v1045_v47, 0  ;;  %vm530_vm12 = vcmask 1046534   ;;  %vm532_vm13 = vcmask 1047559  }
 0x166   : > { %399 = vperm.xlu2 %744, %v350_v31   ;;  %393 = vperm.xlu1 %745, %v348_v32  }
 0x167   : > { %387 = vperm.xlu0 %743, %v346_v33  }
 0x16e   : > { %408 = vperm.xlu2 %744, %v353_v35   ;;  %402 = vperm.xlu1 %745, %v351_v36  }
 0x16f   : > { %396 = vperm.xlu0 %743, %v349_v37  }
 0x176   : > { %417 = vperm.xlu2 %744, %v356_v40   ;;  %411 = vperm.xlu1 %745, %v354_v41  }
 0x177   : > { %405 = vperm.xlu0 %743, %v352_v42  }
 0x17e   : > { %426 = vperm.xlu2 %744, %v359_v2   ;;  %420 = vperm.xlu1 %745, %v357_v44  }
 0x17f   : > { %414 = vperm.xlu0 %743, %v355_v46  }
 0x186   : > { %435 = vperm.xlu2 %744, %v362_v50   ;;  %429 = vperm.xlu1 %745, %v360_v51  }
 0x187   : > { %423 = vperm.xlu0 %743, %v358_v52  }
 0x18e   : > { %444 = vperm.xlu2 %744, %v365_v53   ;;  %438 = vperm.xlu1 %745, %v363_v54  }
 0x18f   : > { %432 = vperm.xlu0 %743, %v361_v55  }
 0x196   : > { %453 = vperm.xlu2 %744, %v368_v0   ;;  %447 = vperm.xlu1 %745, %v366_v6  }
 0x197   : > { %441 = vperm.xlu0 %743, %v364_v8  }
 0x19e   : > { %462 = vperm.xlu2 %744, %v371_v26   ;;  %456 = vperm.xlu1 %745, %v369_v27  }
 0x19f   : > { %450 = vperm.xlu0 %743, %v367_v28  }
 0x1a6   : > { %465 = vperm.xlu1 %745, %v372_v9  }
 0x1a7   : > { %459 = vperm.xlu0 %743, %v370_v11  }
 0x1a8   : > { %v382_v3 = vpop.permute.xlu2 %381 }
 0x1a9   : > { %v475_v8 = vperm.slane %v382_v3, %v1032_v7 }
 0x1af   : > { %468 = vperm.xlu0 %743, %v373_v30  }
 0x1b8   : > { %v391_v57 = vpop.permute.xlu2 %390 }
 0x1b9   : > { %v479_v12 = vperm.slane %v391_v57, %v1226_v4 }
 0x1c0   : > { %v376_v56 = vpop.permute.xlu0 %375  ;;  %v400_v60 = vpop.permute.xlu2 %399 }
 0x1c1   : > { %v470_v9 = vperm.slane %v376_v56, %v1032_v7  ;;  %v484_v21 = vperm.slane %v400_v60, %v1032_v7 }
 0x1c8   : > { %v409_v63 = vpop.permute.xlu2 %408 }
 0x1c9   : > { %v488_v23 = vperm.slane %v409_v63, %v1226_v4 }
 0x1d0   : > { %v385_v58 = vpop.permute.xlu1 %384  ;;  %v418_v13 = vpop.permute.xlu2 %417 }
 0x1d1   : > { %v379_v59 = vpop.permute.xlu0 %378  ;;  %v476_v45 = vperm.slane %v385_v58, %v1226_v4  ;;  %v493_v28 = vperm.slane %v418_v13, %v1032_v7 }
 0x1d2   : > { %v472_v5 = vperm.slane %v379_v59, %v1226_v4 }
 0x1d3   : > { %v477_v14 = vsel %vm473_vm15, %v476_v45, %v475_v8 }
 0x1d4   : > { %v474_v15 = vsel %vm473_vm15, %v472_v5, %v470_v9 }
 0x1d5   : > { %v521_v22 = vsel %vm520_vm0, %v477_v14, %v474_v15 }
 0x1d8   : > { %v394_v61 = vpop.permute.xlu1 %393  ;;  %v427_v36 = vpop.permute.xlu2 %426 }
 0x1d9   : > { %v388_v62 = vpop.permute.xlu0 %387  ;;  %v481_v16 = vperm.slane %v394_v61, %v1032_v7  ;;  %v497_v61 = vperm.slane %v427_v36, %v1226_v4 }
 0x1da   : > { %v478_v47 = vperm.slane %v388_v62, %v1032_v7 }
 0x1dc   : > { %v480_v17 = vsel %vm473_vm15, %v479_v12, %v478_v47 }
 0x1dd   : > { %v523_v24 = vsel %vm522_vm1, %v480_v17, %v521_v22 }
 0x1e0   : > { %v403_v0 = vpop.permute.xlu1 %402  ;;  %v436_v49 = vpop.permute.xlu2 %435 }
 0x1e1   : > { %v397_v1 = vpop.permute.xlu0 %396  ;;  %v485_v18 = vperm.slane %v403_v0, %v1226_v4  ;;  %v502_v0 = vperm.slane %v436_v49, %v1032_v7 }
 0x1e2   : > { %v482_v10 = vperm.slane %v397_v1, %v1226_v4 }
 0x1e3   : > { %v486_v25 = vsel %vm473_vm15, %v485_v18, %v484_v21 }
 0x1e4   : > { %v483_v19 = vsel %vm473_vm15, %v482_v10, %v481_v16 }
 0x1e5   : > { %v525_v26 = vsel %vm524_vm2, %v483_v19, %v523_v24 }
 0x1e6   : > { %v527_v34 = vsel %vm526_vm3, %v486_v25, %v525_v26 }
 0x1e8   : > { %v412_v6 = vpop.permute.xlu1 %411  ;;  %v445_v52 = vpop.permute.xlu2 %444 }
 0x1e9   : > { %v406_v11 = vpop.permute.xlu0 %405  ;;  %v490_v32 = vperm.slane %v412_v6, %v1032_v7  ;;  %v506_v5 = vperm.slane %v445_v52, %v1226_v4 }
 0x1ea   : > { %v487_v20 = vperm.slane %v406_v11, %v1032_v7 }
 0x1ec   : > { %v489_v29 = vsel %vm473_vm15, %v488_v23, %v487_v20 }
 0x1ed   : > { %v529_v37 = vsel %vm528_vm11, %v489_v29, %v527_v34 }
 0x1f0   : > { %v421_v27 = vpop.permute.xlu1 %420  ;;  %v454_v3 = vpop.permute.xlu2 %453 }
 0x1f1   : > { %v494_v30 = vperm.slane %v421_v27, %v1226_v4  ;;  %v415_v31 = vpop.permute.xlu0 %414  ;;  %v511_v15 = vperm.slane %v454_v3, %v1032_v7 }
 0x1f2   : > { %v491_v33 = vperm.slane %v415_v31, %v1226_v4 }
 0x1f3   : > { %v495_v35 = vsel %vm473_vm15, %v494_v30, %v493_v28 }
 0x1f4   : > { %v492_v38 = vsel %vm473_vm15, %v491_v33, %v490_v32 }
 0x1f5   : > { %v531_v39 = vsel %vm530_vm12, %v492_v38, %v529_v37 }
 0x1f6   : > { %v533_v40 = vsel %vm532_vm13, %v495_v35, %v531_v39 }
 0x1f7   : > { %v541_v41 = vsel %vm255_vm6, %v533_v40, 0 }
 0x1f8   : > { %v430_v42 = vpop.permute.xlu1 %429  ;;  %v543_v43 = vshrl.u32 %v541_v41, 16  ;;  %v542_v2 = vand.u32 65535, %v541_v41  ;;  %v463_v10 = vpop.permute.xlu2 %462 }
 0x1f9   : > { %v424_v44 = vpop.permute.xlu0 %423  ;;  %v499_v58 = vperm.slane %v430_v42, %v1032_v7  ;;  %v515_v17 = vperm.slane %v463_v10, %v1226_v4 }
 0x1fa   : > { %v545_v46 = vcvt.s32.f32 %v543_v43  ;;  %v544_v48 = vcvt.s32.f32 %v542_v2  ;;  %v496_v59 = vperm.slane %v424_v44, %v1032_v7 }
 0x1fc   : > { %548 = vadd.xlane.f32.xlu2 %v545_v46  ;;  %546 = vadd.xlane.f32.xlu0 %v544_v48  ;;  %v498_v47 = vsel %vm473_vm15, %v497_v61, %v496_v59 }
 0x200   : > { %v439_v50 = vpop.permute.xlu1 %438 }
 0x201   : > { %v433_v51 = vpop.permute.xlu0 %432  ;;  %v503_v60 = vperm.slane %v439_v50, %v1226_v4 }
 0x202   : > { %v500_v56 = vperm.slane %v433_v51, %v1226_v4 }
 0x203   : > { %v504_v6 = vsel %vm473_vm15, %v503_v60, %v502_v0 }
 0x204   : > { %v501_v62 = vsel %vm473_vm15, %v500_v56, %v499_v58 }
 0x205   : > { %v534_v8 = vsel %vm520_vm0, %v501_v62, %v498_v47 }
 0x206   : > { %v535_v16 = vsel %vm522_vm1, %v504_v6, %v534_v8 }
 0x208   : > { %v448_v54 = vpop.permute.xlu1 %447 }
 0x209   : > { %v442_v53 = vpop.permute.xlu0 %441  ;;  %v508_v9 = vperm.slane %v448_v54, %v1032_v7 }
 0x20a   : > { %v505_v63 = vperm.slane %v442_v53, %v1032_v7 }
 0x20c   : > { %v507_v11 = vsel %vm473_vm15, %v506_v5, %v505_v63 }
 0x20d   : > { %v536_v18 = vsel %vm524_vm2, %v507_v11, %v535_v16 }
 0x210   : > { %v457_v57 = vpop.permute.xlu1 %456 }
 0x211   : > { %v451_v55 = vpop.permute.xlu0 %450  ;;  %v512_v12 = vperm.slane %v457_v57, %v1226_v4 }
 0x212   : > { %v509_v1 = vperm.slane %v451_v55, %v1226_v4 }
 0x213   : > { %v513_v20 = vsel %vm473_vm15, %v512_v12, %v511_v15 }
 0x214   : > { %v510_v13 = vsel %vm473_vm15, %v509_v1, %v508_v9 }
 0x215   : > { %v537_v21 = vsel %vm526_vm3, %v510_v13, %v536_v18 }
 0x216   : > { %v538_v26 = vsel %vm528_vm11, %v513_v20, %v537_v21 }
 0x218   : > { %v466_v19 = vpop.permute.xlu1 %465 }
 0x219   : > { %v460_v45 = vpop.permute.xlu0 %459  ;;  %v517_v24 = vperm.slane %v466_v19, %v1032_v7 }
 0x21a   : > { %v514_v14 = vperm.slane %v460_v45, %v1032_v7 }
 0x21c   : > { %v516_v22 = vsel %vm473_vm15, %v515_v17, %v514_v14 }
 0x21d   : > { %v539_v28 = vsel %vm530_vm12, %v516_v22, %v538_v26 }
 0x221   : > { %v469_v23 = vpop.permute.xlu0 %468 }
 0x222   : > { %v518_v25 = vperm.slane %v469_v23, %v1226_v4 }
 0x224   : > { %v519_v27 = vsel %vm473_vm15, %v518_v25, %v517_v24 }
 0x225   : > { %v540_v29 = vsel %vm532_vm13, %v519_v27, %v539_v28 }
 0x226   : > { %v554_v30 = vsel %vm255_vm6, %v540_v29, 0  ;;  %vm570_vm6 = vcmask 122880  }
 0x227   : > { %v556_v31 = vshrl.u32 %v554_v30, 16  ;;  %v555_v32 = vand.u32 65535, %v554_v30 }
 0x229   : > { %v558_v33 = vcvt.s32.f32 %v556_v31  ;;  %v557_v34 = vcvt.s32.f32 %v555_v32 }
 0x22b   : > { %561 = vadd.xlane.f32.xlu1 %v558_v33  ;;  %559 = vadd.xlane.f32.xlu2 %v557_v34 }
 0x26f   : > { %v549_v35 = vpop.xlane.xlu2 %548  ;;  %v547_v37 = vpop.xlane.xlu0 %546 }
 0x270   : > { %v551_v36 = vcvt.f32.s32 %v549_v35  ;;  %v550_v41 = vcvt.f32.s32 %v547_v37 }
 0x272   : > { %v552_v38 = vshll.u32 %v551_v36, 16 }
 0x274   : > { %v553_v43 = vadd.s32 %v552_v38, %v550_v41 }
 0x276   : > { %v567_v48 = vperm.slane %v553_v43, %v1032_v7 }
 0x29e   : > { %v562_v39 = vpop.xlane.xlu1 %561  ;;  %v560_v40 = vpop.xlane.xlu2 %559 }
 0x29f   : > { %v564_v42 = vcvt.f32.s32 %v562_v39  ;;  %v563_v44 = vcvt.f32.s32 %v560_v40 }
 0x2a1   : > { %v565_v2 = vshll.u32 %v564_v42, 16 }
 0x2a3   : > { %v566_v46 = vadd.s32 %v565_v2, %v563_v44 }
 0x2a5   : > { %v568_v49 = vperm.slane %v566_v46, %v1226_v4 }
 0x2a7   : > { %v569_v50 = vsel %vm473_vm15, %v568_v49, %v567_v48 }
 0x2a8   : > { %571 = vst.msk [vmem:[%s198_s7] sm:$0x1] %vm570_vm6, %v569_v50 }
 0x2a9   : > { %835 = shalt.err (!%p832_p0)
}
 0x2aa   : > { %690 = dma.vmem_to_hbm [thread:$0]  (%p947_p11), %s584_s8, 16, %s586_s14, %s573_s16  }
 0x2ab PF: > { %s597_s23 = sand.u32 1, %s866_s9   ;;  %p1356_p1 = scmp.ge.s32.totalorder %s878_s12, 2 }
 0x2ac   : > { %s598_s25 = scalar_lea.sflag [#allocation4], %s597_s23 }
 0x2ad   : > { %p700_p4 = pnand %p1356_p1, %p951_p12 }
 0x2af   : > { %p701_p7 = pneg %p700_p4 }
 0x2b1   : > { %861 = dma.done.wait (%p701_p7), %s598_s25, 16  }
 0x2b2   : > { %863 = vsyncadd (%p701_p7), %s598_s25, 4294967280  ;;  %p18_p5 = scmp.ge.s32.totalorder %s922_s15, 4   ;;  %s1357_s9 = smov %s870_s10 }
 0x2b3   : > { %s1358_s10 = smov %s874_s11  ;;  %s1359_s11 = smov %s934_s18 }
 0x2b4   : > { %s1360_s12 = smov %s922_s15  ;;  %20 = sbr.rel (!%p18_p5) target bundleno = 7 (0x7), region = 86 }
 0x2b9   :  { %603 = vsyncpa [#allocation3], 1 }
 0x2ba   :  { %605 = vsyncpa [#allocation3 + $0x1], 1 }
 0x2bb   :  { %606 = vsyncpa [#allocation6], 1 }
 0x2bc   :  { %608 = vsyncpa [#allocation6 + $0x1], 1 }
 0x2bd   :  { %609 = vsyncpa [#allocation4], 1 }
 0x2be   :  { %611 = vsyncpa [#allocation4 + $0x1], 1 }

</bundles_post_ra>
